<compile_context>
chip_gen: v6e
topology: v6e:2x2x1
jax: 0.10.0
libtpu: 0.0.40
codegen_flags: <defaults>
</compile_context>

<pallas_src>
import functools

import jax
import jax.numpy as jnp
from jax.experimental import pallas as pl
from jax.experimental.pallas import tpu as pltpu


_OUT_PAD = 8  # output / weight column padding (>= out_features=2, sublane-friendly)


def _round_up(x, m):
    return ((x + m - 1) // m) * m


def _vmem_capacity_bytes():
    """Per-core VMEM capacity; conservative 64 MiB (v7x) if the query fails."""
    try:
        info = pltpu.get_tpu_info()
        cap = getattr(info, "vmem_capacity_bytes", None)
        if cap:
            return int(cap)
    except Exception:
        pass
    return 64 * 1024 * 1024


def _choose_batch_tile(batch, input_dim, in_itemsize, out_cols):
    """Batch tile: multiple of 8, ~2 MiB of x per tile, VMEM- and grid-aware.

    Returns None if even a minimal tile + resident weight would not fit in the
    VMEM budget (caller falls back to plain XLA).
    """
    cap = _vmem_capacity_bytes()
    budget = cap // 2  # headroom for Mosaic scratch / compiler internals

    resident = input_dim * out_cols * in_itemsize + out_cols * 4  # W^T + bias (1 buf)
    per_row = 2 * input_dim * in_itemsize + 2 * out_cols * 4      # dbl-buffered x + out
    avail = budget - resident
    if avail < 8 * per_row:
        return None

    tb_vmem = (avail // per_row) // 8 * 8
    # DMA efficiency target: ~2 MiB of x per tile (amortize ~0.35 us/step).
    tb_dma = max(8, ((2 * 1024 * 1024) // max(input_dim * in_itemsize, 1)) // 8 * 8)
    tb = min(tb_vmem, tb_dma)
    # Keep >= 4 grid steps when the batch allows (pipelining + v7x megacore).
    steps_cap = max(8, _round_up(-(-batch // 4), 8))
    tb = min(tb, steps_cap)
    return max(8, int(tb))


def _linear_kernel(x_ref, w_ref, b_ref, o_ref):
    # x_ref: (TB, D), w_ref: (D, 8), b_ref: (1, 8), o_ref: (TB, 8)
    acc = jnp.dot(x_ref[...], w_ref[...], preferred_element_type=jnp.float32)
    o_ref[...] = (acc + b_ref[...]).astype(o_ref.dtype)


@functools.partial(jax.jit, static_argnames=("tb", "use_bf16", "allow_fast_path"))
def simple_classifier_forward(x, weight, bias, *, tb=None, use_bf16=False,
                              allow_fast_path=True):
    """Equivalent of SimpleClassifier.forward: x @ weight.T + bias.

    Args:
      x:      (batch, input_dim) float32
      weight: (out_features, input_dim) float32  (PyTorch nn.Linear layout)
      bias:   (out_features,)            float32
    Returns:
      (batch, out_features) float32
    """
    batch, input_dim = x.shape
    out_features = weight.shape[0]

    in_dtype = jnp.bfloat16 if use_bf16 else jnp.float32
    in_itemsize = 2 if use_bf16 else 4

    if tb is None:
        tb = _choose_batch_tile(batch, input_dim, in_itemsize, _OUT_PAD)
    else:
        tb = max(8, _round_up(int(tb), 8))

    # Plain-XLA path: single-tile problems (no pipelining to exploit, launch
    # plumbing dominates) and VMEM-infeasible shapes (tb is None).
    if tb is None or (allow_fast_path and batch <= tb):
        return (x.astype(jnp.float32) @ weight.T.astype(jnp.float32)
                + bias.astype(jnp.float32))

    # Column-pad W^T / bias to 8 lanes; zero columns are sliced off below.
    x_in = x.astype(in_dtype)
    w_t = (
        jnp.zeros((input_dim, _OUT_PAD), in_dtype)
        .at[:, :out_features]
        .set(weight.T.astype(in_dtype))
    )
    b_pad = (
        jnp.zeros((1, _OUT_PAD), jnp.float32)
        .at[:, :out_features]
        .set(bias.astype(jnp.float32))
    )

    grid = (pl.cdiv(batch, tb),)

    est_vmem = (
        2 * tb * input_dim * in_itemsize      # double-buffered x stream
        + 2 * tb * _OUT_PAD * 4               # double-buffered output
        + input_dim * _OUT_PAD * in_itemsize  # resident W^T (single buffer)
        + _OUT_PAD * 4                        # resident bias
    )
    cap = _vmem_capacity_bytes()
    vmem_limit = int(min(0.9 * cap, max(32 * 1024 * 1024, 1.5 * est_vmem)))

    cost = pl.CostEstimate(
        flops=2 * batch * input_dim * _OUT_PAD,
        transcendentals=0,
        bytes_accessed=(
            batch * input_dim * in_itemsize       # read x
            + input_dim * _OUT_PAD * in_itemsize  # read W^T (once, resident)
            + _OUT_PAD * 4                        # read bias
            + batch * _OUT_PAD * 4                # write narrow output
        ),
    )

    out_padded = pl.pallas_call(
        _linear_kernel,
        out_shape=jax.ShapeDtypeStruct((batch, _OUT_PAD), jnp.float32),
        grid_spec=pltpu.PrefetchScalarGridSpec(
            num_scalar_prefetch=0,
            grid=grid,
            in_specs=[
                # x: streamed batch tiles, double-buffered by the pipeline.
                pl.BlockSpec((tb, input_dim), lambda i: (i, 0)),
                # W^T: resident, single-buffered (constant index_map).
                pl.BlockSpec((input_dim, _OUT_PAD), lambda i: (0, 0),
                             pipeline_mode=pl.Buffered(1)),
                # bias: resident, single-buffered.
                pl.BlockSpec((1, _OUT_PAD), lambda i: (0, 0),
                             pipeline_mode=pl.Buffered(1)),
            ],
            out_specs=pl.BlockSpec((tb, _OUT_PAD), lambda i: (i, 0)),
        ),
        compiler_params=pltpu.CompilerParams(
            # Independent batch tiles -> both v7x TensorCores; neutral on v5e/v6e.
            dimension_semantics=("parallel",),
            vmem_limit_bytes=vmem_limit,
        ),
        cost_estimate=cost,
    )(x_in, w_t, b_pad)

    return out_padded[:, :out_features]


if __name__ == "__main__":
    key = jax.random.PRNGKey(0)
    k_x, k_w, k_b = jax.random.split(key, 3)

    input_dim = 32
    out_features = 2

    # Deterministic parameter init (mimics nn.Linear's uniform init range).
    bound = 1.0 / (input_dim ** 0.5)
    weight = jax.random.uniform(
        k_w, (out_features, input_dim), jnp.float32, minval=-bound, maxval=bound
    )
    bias = jax.random.uniform(
        k_b, (out_features,), jnp.float32, minval=-bound, maxval=bound
    )

    # Case 1: Pallas path, auto tile (grid of 4 batch tiles).
    batch1 = 1024
    x1 = jax.random.normal(k_x, (batch1, input_dim), jnp.float32)
    out1 = jax.block_until_ready(simple_classifier_forward(x1, weight, bias))
    ref1 = x1 @ weight.T + bias
    assert out1.shape == (batch1, out_features)
    assert jnp.allclose(out1, ref1, atol=1e-5, rtol=1e-5), "mismatch (pallas path)"

    # Case 2: ragged batch (not a multiple of the tile) -> partial last block.
    batch2 = 27
    x2 = jax.random.normal(jax.random.PRNGKey(1), (batch2, input_dim), jnp.float32)
    out2 = jax.block_until_ready(
        simple_classifier_forward(x2, weight, bias, tb=8)
    )
    ref2 = x2 @ weight.T + bias
    assert out2.shape == (batch2, out_features)
    assert jnp.allclose(out2, ref2, atol=1e-5, rtol=1e-5), "mismatch (ragged batch)"

    # Case 3: tiny batch -> single-tile fast path (plain XLA).
    batch3 = 8
    x3 = jax.random.normal(jax.random.PRNGKey(2), (batch3, input_dim), jnp.float32)
    out3 = jax.block_until_ready(simple_classifier_forward(x3, weight, bias))
    ref3 = x3 @ weight.T + bias
    assert out3.shape == (batch3, out_features)
    assert jnp.allclose(out3, ref3, atol=1e-5, rtol=1e-5), "mismatch (fast path)"

    # Case 4: bf16 input/weight stream (f32 accumulate), looser tolerance.
    out4 = jax.block_until_ready(
        simple_classifier_forward(x1, weight, bias, use_bf16=True)
    )
    assert out4.shape == (batch1, out_features)
    assert jnp.allclose(out4, ref1, atol=3e-2, rtol=3e-2), "mismatch (bf16 path)"

    print("KERNEL_OK")
</pallas_src>

<mosaic_0001>
module attributes {stable_mosaic.version = 11 : i64} {
  func.func @_linear_kernel(%arg0: i32, %arg1: memref<256x32xf32, #tpu.memory_space<vmem>>, %arg2: memref<32x8xf32, #tpu.memory_space<vmem>>, %arg3: memref<1x8xf32, #tpu.memory_space<vmem>>, %arg4: memref<256x8xf32, #tpu.memory_space<vmem>>) attributes {dimension_semantics = [#tpu.dimension_semantics<parallel>], iteration_bounds = array<i64: 4>, scalar_prefetch = 0 : i64, scratch_operands = 0 : i64, tpu.core_type = #tpu.core_type<tc>, window_params = [{transform_indices = @transform_0, window_bounds = array<i64: 256, 32>}, {pipeline_mode = #tpu.pipeline_mode<synchronous>, transform_indices = @transform_1, window_bounds = array<i64: 32, 8>}, {pipeline_mode = #tpu.pipeline_mode<synchronous>, transform_indices = @transform_2, window_bounds = array<i64: 1, 8>}, {transform_indices = @transform_3, window_bounds = array<i64: 256, 8>}]} {
    %c0 = arith.constant 0 : index
    %c0_0 = arith.constant 0 : index
    %0 = vector.load %arg1[%c0, %c0_0] : memref<256x32xf32, #tpu.memory_space<vmem>>, vector<256x32xf32>
    %c0_1 = arith.constant 0 : index
    %c0_2 = arith.constant 0 : index
    %1 = vector.load %arg2[%c0_1, %c0_2] : memref<32x8xf32, #tpu.memory_space<vmem>>, vector<32x8xf32>
    %cst = arith.constant dense<0.000000e+00> : vector<256x8xf32>
    %2 = tpu.matmul %0, %1, %cst {dimension_numbers = #tpu.dot_dimension_numbers<[1], [0], [0], [1], [0, 0, 1, 1], [], []>} : vector<256x32xf32>, vector<32x8xf32>, vector<256x8xf32> -> vector<256x8xf32>
    %c0_3 = arith.constant 0 : index
    %c0_4 = arith.constant 0 : index
    %3 = vector.load %arg3[%c0_3, %c0_4] : memref<1x8xf32, #tpu.memory_space<vmem>>, vector<1x8xf32>
    %4 = vector.broadcast %3 : vector<1x8xf32> to vector<256x8xf32>
    %5 = arith.addf %2, %4 : vector<256x8xf32>
    %c0_5 = arith.constant 0 : index
    %c0_6 = arith.constant 0 : index
    %6 = vector.load %arg4[%c0_5, %c0_6] : memref<256x8xf32, #tpu.memory_space<vmem>>, vector<256x8xf32>
    tpu.vector_store %arg4[%c0_5, %c0_6], %5 {strides = array<i32>} : memref<256x8xf32, #tpu.memory_space<vmem>>, vector<256x8xf32>,
    return
  }
  func.func @transform_0(%arg0: i32) -> (i32, i32) {
    %c0_i32 = arith.constant 0 : i32
    %c0_i32_0 = arith.constant 0 : i32
    return %arg0, %c0_i32 : i32, i32
  }
  func.func @transform_1(%arg0: i32) -> (i32, i32) {
    %c0_i32 = arith.constant 0 : i32
    %c0_i32_0 = arith.constant 0 : i32
    %c0_i32_1 = arith.constant 0 : i32
    return %c0_i32, %c0_i32_0 : i32, i32
  }
  func.func @transform_2(%arg0: i32) -> (i32, i32) {
    %c0_i32 = arith.constant 0 : i32
    %c0_i32_0 = arith.constant 0 : i32
    %c0_i32_1 = arith.constant 0 : i32
    return %c0_i32, %c0_i32_0 : i32, i32
  }
  func.func @transform_3(%arg0: i32) -> (i32, i32) {
    %c0_i32 = arith.constant 0 : i32
    %c0_i32_0 = arith.constant 0 : i32
    return %arg0, %c0_i32 : i32, i32
  }
}

</mosaic_0001>

<bundles_post_ra>
// kernel: simple_classifier_forward.1
= control target key start
LH: loop header
LB: loop body
LE: loop exit
PB: predicated region body
PF: predicated region fallthrough
CT: control target
= control target key end

     0   :  { %s808_s12 = smov 0   ;;  %s1013_s0 = inlined_call_operand.vmem [shape: f32[1024,32], index: 0, kind: input, shape index: {}]   ;;  %s1014_s1 = inlined_call_operand.vmem [shape: f32[32,8], index: 1, kind: input, shape index: {}]   ;;  %s1015_s2 = inlined_call_operand.vmem [shape: f32[1,8], index: 2, kind: input, shape index: {}]   ;;  %s1016_s3 = inlined_call_operand.vmem [shape: f32[1024,8], index: 3, kind: output, shape index: {}]  }
   0x1 LB: > { %s628_s13 = sadd.s32 4294967295, %s786_s12   ;;  %p632_p0 = scmp.ge.s32.totalorder %s786_s12, 1  ;;  %s786_s12 = sphi %s808_s12, %s13_s12  }
   0x2   : > { %p138_p1 = scmp.lt.s32.totalorder %s786_s12, 5 }
   0x4   : > { %p139_p2 = pnand %p632_p0, %p138_p1 }
   0x5   : > { %s633_s18 = sshll.u32 (!%p139_p2), %s628_s13, 5 }
   0x6   : > { %142 = sbr.rel (%p139_p2) target bundleno = 247 (0xf7), region = 32  ;;  %p163_p3 = scmp.lt.s32.totalorder (!%p139_p2), %s633_s18, 127 }
   0xb   : > { %v209_v0 = vld [vmem:[%s1014_s1 + $0x18] sm:$0xff]  ;;  %v208_v1 = vld [vmem:[%s1014_s1 + $0x10] sm:$0xff]  ;;  %v207_v2 = vld [vmem:[%s1014_s1 + $0x8] sm:$0xff]  ;;  %s1018_s18 = smov (!%p163_p3, %s633_s18), 127  ;;  %vm217_vm0 = vcmask 261120   ;;  %vm539_vm1 = vcmask 64512  }
   0xc   : > { %708 = vmatprep.subr.mxu0 %v209_v0  ;;  %764 = vmatprep.subr.mxu1 %v209_v0  ;;  %v206_v3 = vld [vmem:[%s1014_s1] sm:$0xff]  ;;  %s634_s23 = sshll.u32 %s1018_s18, 3 }
   0xd   : > { %709 = vmatpush3.msra.mxu0 %v209_v0  ;;  %768 = vmatpush3.msra.mxu1 %v209_v0  ;;  %s836_s26 = scalar_lea.vmem %s1013_s0, %s634_s23  ;;  %v905_v36 = vld [vmem:[%s1015_s2] ss:$0 sm:$0xff]  ;;  %s912_s4 = scalar_lea.vmem %s1016_s3, %s634_s23 }
   0xe   : > { %710 = vmatprep.subr.mxu0 %v208_v1  ;;  %765 = vmatprep.subr.mxu1 %v208_v1  ;;  %v174_v4 = vld [vmem:[%s836_s26] sm:$0xff]  ;;  %v175_v6 = vld [vmem:[%s836_s26 + $0x8] sm:$0xff]  ;;  %v176_v8 = vld [vmem:[%s836_s26 + $0x10] sm:$0xff] }
   0xf   : > { %711 = vmatpush3.msra.mxu0 %v208_v1  ;;  %769 = vmatpush3.msra.mxu1 %v208_v1  ;;  %v190_v5 = vld [vmem:[%s836_s26 + $0x80] sm:$0xff]  ;;  %v191_v7 = vld [vmem:[%s836_s26 + $0x88] sm:$0xff]  ;;  %v192_v9 = vld [vmem:[%s836_s26 + $0x90] sm:$0xff] }
  0x10   : > { %712 = vmatprep.subr.mxu0 %v207_v2  ;;  %766 = vmatprep.subr.mxu1 %v207_v2  ;;  %v177_v10 = vld [vmem:[%s836_s26 + $0x18] sm:$0xff]  ;;  %v178_v12 = vld [vmem:[%s836_s26 + $0x20] sm:$0xff]  ;;  %v179_v14 = vld [vmem:[%s836_s26 + $0x28] sm:$0xff] }
  0x11   : > { %713 = vmatpush3.msra.mxu0 %v207_v2  ;;  %770 = vmatpush3.msra.mxu1 %v207_v2  ;;  %v193_v11 = vld [vmem:[%s836_s26 + $0x98] sm:$0xff]  ;;  %v194_v13 = vld [vmem:[%s836_s26 + $0xa0] sm:$0xff]  ;;  %v195_v15 = vld [vmem:[%s836_s26 + $0xa8] sm:$0xff] }
  0x12   : > { %714 = vmatprep.subr.mxu0 %v206_v3  ;;  %767 = vmatprep.subr.mxu1 %v206_v3  ;;  %v180_v16 = vld [vmem:[%s836_s26 + $0x30] sm:$0xff]  ;;  %v181_v18 = vld [vmem:[%s836_s26 + $0x38] sm:$0xff]  ;;  %v182_v20 = vld [vmem:[%s836_s26 + $0x40] sm:$0xff] }
  0x13   : > { %715 = vmatpush3.msra.mxu0 %v206_v3  ;;  %771 = vmatpush3.msra.mxu1 %v206_v3  ;;  %v196_v17 = vld [vmem:[%s836_s26 + $0xb0] sm:$0xff]  ;;  %v197_v19 = vld [vmem:[%s836_s26 + $0xb8] sm:$0xff]  ;;  %v198_v21 = vld [vmem:[%s836_s26 + $0xc0] sm:$0xff] }
  0x14   : > { %716 = vmatprep.mubr.msk.f32.mxu0 %vm217_vm0, %v174_v4  ;;  %740 = vmatprep.mubr.msk.f32.mxu1 %vm217_vm0, %v190_v5  ;;  %v183_v22 = vld [vmem:[%s836_s26 + $0x48] sm:$0xff]  ;;  %v184_v24 = vld [vmem:[%s836_s26 + $0x50] sm:$0xff]  ;;  %v185_v26 = vld [vmem:[%s836_s26 + $0x58] sm:$0xff] }
  0x15   : > { %717 = vmatmul.mubr.msk.f32.vlgmr.msra.gmra.mxu0 %vm217_vm0, %v175_v6  ;;  %741 = vmatmul.mubr.msk.f32.vlgmr.msra.gmra.mxu1 %vm217_vm0, %v191_v7  ;;  %v199_v23 = vld [vmem:[%s836_s26 + $0xc8] sm:$0xff]  ;;  %v200_v25 = vld [vmem:[%s836_s26 + $0xd0] sm:$0xff]  ;;  %v201_v27 = vld [vmem:[%s836_s26 + $0xd8] sm:$0xff] }
  0x16   : > { %719 = vmatprep.mubr.msk.f32.mxu0 %vm217_vm0, %v176_v8  ;;  %743 = vmatprep.mubr.msk.f32.mxu1 %vm217_vm0, %v192_v9  ;;  %v186_v28 = vld [vmem:[%s836_s26 + $0x60] sm:$0xff]  ;;  %v187_v30 = vld [vmem:[%s836_s26 + $0x68] sm:$0xff]  ;;  %v188_v32 = vld [vmem:[%s836_s26 + $0x70] sm:$0xff] }
  0x17   : > { %v202_v29 = vld [vmem:[%s836_s26 + $0xe0] sm:$0xff]  ;;  %v203_v31 = vld [vmem:[%s836_s26 + $0xe8] sm:$0xff]  ;;  %v204_v33 = vld [vmem:[%s836_s26 + $0xf0] sm:$0xff] }
  0x18   : > { %v189_v34 = vld [vmem:[%s836_s26 + $0x78] sm:$0xff] }
  0x19   : > { %720 = vmatmul.mubr.msk.f32.gmra.mxu0 %vm217_vm0, %v177_v10  ;;  %744 = vmatmul.mubr.msk.f32.gmra.mxu1 %vm217_vm0, %v193_v11  ;;  %v205_v35 = vld [vmem:[%s836_s26 + $0xf8] sm:$0xff] }
  0x1a   : > { %722 = vmatprep.mubr.msk.f32.mxu0 %vm217_vm0, %v178_v12  ;;  %746 = vmatprep.mubr.msk.f32.mxu1 %vm217_vm0, %v194_v13 }
  0x1d   : > { %723 = vmatmul.mubr.msk.f32.gmra.mxu0 %vm217_vm0, %v179_v14  ;;  %747 = vmatmul.mubr.msk.f32.gmra.mxu1 %vm217_vm0, %v195_v15 }
  0x1e   : > { %725 = vmatprep.mubr.msk.f32.mxu0 %vm217_vm0, %v180_v16  ;;  %749 = vmatprep.mubr.msk.f32.mxu1 %vm217_vm0, %v196_v17 }
  0x21   : > { %726 = vmatmul.mubr.msk.f32.gmra.mxu0 %vm217_vm0, %v181_v18  ;;  %750 = vmatmul.mubr.msk.f32.gmra.mxu1 %vm217_vm0, %v197_v19 }
  0x22   : > { %728 = vmatprep.mubr.msk.f32.mxu0 %vm217_vm0, %v182_v20  ;;  %752 = vmatprep.mubr.msk.f32.mxu1 %vm217_vm0, %v198_v21 }
  0x25   : > { %729 = vmatmul.mubr.msk.f32.gmra.mxu0 %vm217_vm0, %v183_v22  ;;  %753 = vmatmul.mubr.msk.f32.gmra.mxu1 %vm217_vm0, %v199_v23 }
  0x26   : > { %731 = vmatprep.mubr.msk.f32.mxu0 %vm217_vm0, %v184_v24  ;;  %755 = vmatprep.mubr.msk.f32.mxu1 %vm217_vm0, %v200_v25 }
  0x29   : > { %732 = vmatmul.mubr.msk.f32.gmra.mxu0 %vm217_vm0, %v185_v26  ;;  %756 = vmatmul.mubr.msk.f32.gmra.mxu1 %vm217_vm0, %v201_v27 }
  0x2a   : > { %734 = vmatprep.mubr.msk.f32.mxu0 %vm217_vm0, %v186_v28  ;;  %758 = vmatprep.mubr.msk.f32.mxu1 %vm217_vm0, %v202_v29 }
  0x2d   : > { %735 = vmatmul.mubr.msk.f32.gmra.mxu0 %vm217_vm0, %v187_v30  ;;  %759 = vmatmul.mubr.msk.f32.gmra.mxu1 %vm217_vm0, %v203_v31 }
  0x2e   : > { %737 = vmatprep.mubr.msk.f32.mxu0 %vm217_vm0, %v188_v32  ;;  %761 = vmatprep.mubr.msk.f32.mxu1 %vm217_vm0, %v204_v33 }
  0x31   : > { %738 = vmatmul.mubr.msk.f32.gmra.mxu0 %vm217_vm0, %v189_v34  ;;  %762 = vmatmul.mubr.msk.f32.gmra.mxu1 %vm217_vm0, %v205_v35 }
  0xd5   : > { %v718_v37 = vpop.f32.mrf.mxu0  ;;  %v742_v38 = vpop.f32.mrf.mxu1 }
  0xd6   : > { %v386_v39 = vadd.f32 %v718_v37, %v905_v36  ;;  %v466_v40 = vadd.f32 %v742_v38, %v905_v36 }
  0xd7   : > { %v380_v41 = vpop.f32.mrf.mxu0  ;;  %v460_v42 = vpop.f32.mrf.mxu1 }
  0xd8   : > { %541 = vst.msk [vmem:[%s912_s4 + $0x8] sm:$0xff] %vm539_vm1, %v386_v39  ;;  %557 = vst.msk [vmem:[%s912_s4 + $0x88] sm:$0xff] %vm539_vm1, %v466_v40  ;;  %v381_v43 = vadd.f32 %v905_v36, %v380_v41  ;;  %v461_v44 = vadd.f32 %v905_v36, %v460_v42 }
  0xd9   : > { %v721_v45 = vpop.f32.mrf.mxu0  ;;  %v745_v46 = vpop.f32.mrf.mxu1 }
  0xda   : > { %540 = vst.msk [vmem:[%s912_s4] sm:$0xff] %vm539_vm1, %v381_v43  ;;  %556 = vst.msk [vmem:[%s912_s4 + $0x80] sm:$0xff] %vm539_vm1, %v461_v44  ;;  %v396_v47 = vadd.f32 %v721_v45, %v905_v36  ;;  %v476_v48 = vadd.f32 %v745_v46, %v905_v36 }
  0xdb   : > { %v390_v49 = vpop.f32.mrf.mxu0  ;;  %v470_v50 = vpop.f32.mrf.mxu1 }
  0xdc   : > { %543 = vst.msk [vmem:[%s912_s4 + $0x18] sm:$0xff] %vm539_vm1, %v396_v47  ;;  %559 = vst.msk [vmem:[%s912_s4 + $0x98] sm:$0xff] %vm539_vm1, %v476_v48  ;;  %v391_v51 = vadd.f32 %v905_v36, %v390_v49  ;;  %v471_v52 = vadd.f32 %v905_v36, %v470_v50 }
  0xdd   : > { %v724_v53 = vpop.f32.mrf.mxu0  ;;  %v748_v54 = vpop.f32.mrf.mxu1 }
  0xde   : > { %542 = vst.msk [vmem:[%s912_s4 + $0x10] sm:$0xff] %vm539_vm1, %v391_v51  ;;  %558 = vst.msk [vmem:[%s912_s4 + $0x90] sm:$0xff] %vm539_vm1, %v471_v52  ;;  %v406_v55 = vadd.f32 %v724_v53, %v905_v36  ;;  %v486_v56 = vadd.f32 %v748_v54, %v905_v36 }
  0xdf   : > { %v400_v57 = vpop.f32.mrf.mxu0  ;;  %v480_v58 = vpop.f32.mrf.mxu1 }
  0xe0   : > { %545 = vst.msk [vmem:[%s912_s4 + $0x28] sm:$0xff] %vm539_vm1, %v406_v55  ;;  %561 = vst.msk [vmem:[%s912_s4 + $0xa8] sm:$0xff] %vm539_vm1, %v486_v56  ;;  %v401_v59 = vadd.f32 %v905_v36, %v400_v57  ;;  %v481_v60 = vadd.f32 %v905_v36, %v480_v58 }
  0xe1   : > { %v727_v61 = vpop.f32.mrf.mxu0  ;;  %v751_v62 = vpop.f32.mrf.mxu1 }
  0xe2   : > { %544 = vst.msk [vmem:[%s912_s4 + $0x20] sm:$0xff] %vm539_vm1, %v401_v59  ;;  %560 = vst.msk [vmem:[%s912_s4 + $0xa0] sm:$0xff] %vm539_vm1, %v481_v60  ;;  %v416_v63 = vadd.f32 %v727_v61, %v905_v36  ;;  %v496_v0 = vadd.f32 %v751_v62, %v905_v36 }
  0xe3   : > { %v410_v1 = vpop.f32.mrf.mxu0  ;;  %v490_v2 = vpop.f32.mrf.mxu1 }
  0xe4   : > { %547 = vst.msk [vmem:[%s912_s4 + $0x38] sm:$0xff] %vm539_vm1, %v416_v63  ;;  %563 = vst.msk [vmem:[%s912_s4 + $0xb8] sm:$0xff] %vm539_vm1, %v496_v0  ;;  %v411_v3 = vadd.f32 %v905_v36, %v410_v1  ;;  %v491_v4 = vadd.f32 %v905_v36, %v490_v2 }
  0xe5   : > { %v730_v5 = vpop.f32.mrf.mxu0  ;;  %v754_v6 = vpop.f32.mrf.mxu1 }
  0xe6   : > { %546 = vst.msk [vmem:[%s912_s4 + $0x30] sm:$0xff] %vm539_vm1, %v411_v3  ;;  %562 = vst.msk [vmem:[%s912_s4 + $0xb0] sm:$0xff] %vm539_vm1, %v491_v4  ;;  %v426_v7 = vadd.f32 %v730_v5, %v905_v36  ;;  %v506_v8 = vadd.f32 %v754_v6, %v905_v36 }
  0xe7   : > { %v420_v9 = vpop.f32.mrf.mxu0  ;;  %v500_v10 = vpop.f32.mrf.mxu1 }
  0xe8   : > { %549 = vst.msk [vmem:[%s912_s4 + $0x48] sm:$0xff] %vm539_vm1, %v426_v7  ;;  %565 = vst.msk [vmem:[%s912_s4 + $0xc8] sm:$0xff] %vm539_vm1, %v506_v8  ;;  %v421_v11 = vadd.f32 %v905_v36, %v420_v9  ;;  %v501_v12 = vadd.f32 %v905_v36, %v500_v10 }
  0xe9   : > { %v733_v13 = vpop.f32.mrf.mxu0  ;;  %v757_v14 = vpop.f32.mrf.mxu1 }
  0xea   : > { %548 = vst.msk [vmem:[%s912_s4 + $0x40] sm:$0xff] %vm539_vm1, %v421_v11  ;;  %564 = vst.msk [vmem:[%s912_s4 + $0xc0] sm:$0xff] %vm539_vm1, %v501_v12  ;;  %v436_v15 = vadd.f32 %v733_v13, %v905_v36  ;;  %v516_v16 = vadd.f32 %v757_v14, %v905_v36 }
  0xeb   : > { %v430_v17 = vpop.f32.mrf.mxu0  ;;  %v510_v18 = vpop.f32.mrf.mxu1 }
  0xec   : > { %551 = vst.msk [vmem:[%s912_s4 + $0x58] sm:$0xff] %vm539_vm1, %v436_v15  ;;  %567 = vst.msk [vmem:[%s912_s4 + $0xd8] sm:$0xff] %vm539_vm1, %v516_v16  ;;  %v431_v19 = vadd.f32 %v905_v36, %v430_v17  ;;  %v511_v20 = vadd.f32 %v905_v36, %v510_v18 }
  0xed   : > { %v736_v21 = vpop.f32.mrf.mxu0  ;;  %v760_v22 = vpop.f32.mrf.mxu1 }
  0xee   : > { %550 = vst.msk [vmem:[%s912_s4 + $0x50] sm:$0xff] %vm539_vm1, %v431_v19  ;;  %566 = vst.msk [vmem:[%s912_s4 + $0xd0] sm:$0xff] %vm539_vm1, %v511_v20  ;;  %v446_v23 = vadd.f32 %v736_v21, %v905_v36  ;;  %v526_v24 = vadd.f32 %v760_v22, %v905_v36 }
  0xef   : > { %v440_v25 = vpop.f32.mrf.mxu0  ;;  %v520_v26 = vpop.f32.mrf.mxu1 }
  0xf0   : > { %553 = vst.msk [vmem:[%s912_s4 + $0x68] sm:$0xff] %vm539_vm1, %v446_v23  ;;  %569 = vst.msk [vmem:[%s912_s4 + $0xe8] sm:$0xff] %vm539_vm1, %v526_v24  ;;  %v441_v27 = vadd.f32 %v905_v36, %v440_v25  ;;  %v521_v28 = vadd.f32 %v905_v36, %v520_v26 }
  0xf1   : > { %v739_v29 = vpop.f32.mrf.mxu0  ;;  %v763_v30 = vpop.f32.mrf.mxu1 }
  0xf2   : > { %552 = vst.msk [vmem:[%s912_s4 + $0x60] sm:$0xff] %vm539_vm1, %v441_v27  ;;  %568 = vst.msk [vmem:[%s912_s4 + $0xe0] sm:$0xff] %vm539_vm1, %v521_v28  ;;  %v456_v31 = vadd.f32 %v739_v29, %v905_v36  ;;  %v536_v32 = vadd.f32 %v763_v30, %v905_v36 }
  0xf3   : > { %v450_v33 = vpop.f32.mrf.mxu0  ;;  %v530_v34 = vpop.f32.mrf.mxu1 }
  0xf4   : > { %555 = vst.msk [vmem:[%s912_s4 + $0x78] sm:$0xff] %vm539_vm1, %v456_v31  ;;  %571 = vst.msk [vmem:[%s912_s4 + $0xf8] sm:$0xff] %vm539_vm1, %v536_v32  ;;  %v451_v35 = vadd.f32 %v905_v36, %v450_v33  ;;  %v531_v37 = vadd.f32 %v905_v36, %v530_v34 }
  0xf6   : > { %554 = vst.msk [vmem:[%s912_s4 + $0x70] sm:$0xff] %vm539_vm1, %v451_v35  ;;  %570 = vst.msk [vmem:[%s912_s4 + $0xf0] sm:$0xff] %vm539_vm1, %v531_v37 }
  0xf7 PF: > { %s13_s12 = sadd.s32 1, %s786_s12  }
  0xf8   : > { %p10_p4 = scmp.ge.s32.totalorder %s13_s12, 6  }
  0xfa   :  { %12 = sbr.rel (!%p10_p4) target bundleno = 1 (0x1), region = 62 }

</bundles_post_ra>
